<compile_context>
chip_gen: v6e
topology: v6e:2x2x1
jax: 0.10.0
libtpu: 0.0.40
codegen_flags: <defaults>
</compile_context>

<pallas_src>
import math

import jax
import jax.numpy as jnp
from jax.experimental import pallas as pl
from jax.experimental.pallas import tpu as pltpu


def _round_up(a: int, b: int) -> int:
    return (a + b - 1) // b * b


def _vmem_budget_bytes() -> int:
    """~80% of per-core VMEM capacity, generation-aware; conservative fallback."""
    try:
        cap = int(pltpu.get_tpu_info().vmem_capacity_bytes)
    except Exception:
        cap = 64 << 20  # v7x per-TensorCore VMEM (most restrictive generation)
    return int(cap * 0.8)


# ---------------- Fast path: weight fully VMEM-resident ----------------

def _resident_kernel(x_ref, w_ref, o_ref):
    o_ref[...] = jnp.dot(
        x_ref[...], w_ref[...], preferred_element_type=jnp.float32
    ).astype(o_ref.dtype)


def _resident_bias_kernel(x_ref, w_ref, b_ref, o_ref):
    acc = jnp.dot(x_ref[...], w_ref[...], preferred_element_type=jnp.float32)
    o_ref[...] = (acc + b_ref[...].astype(jnp.float32)).astype(o_ref.dtype)


# ---------------- Fallback: (m, n, k) tiling for very large weights ----------------

def _tiled_body(x_ref, w_ref, o_ref, acc_ref, *, bias_ref=None):
    k = pl.program_id(2)

    @pl.when(k == 0)
    def _():
        acc_ref[...] = jnp.zeros_like(acc_ref)

    acc_ref[...] += jnp.dot(
        x_ref[...], w_ref[...], preferred_element_type=jnp.float32
    )

    @pl.when(k == pl.num_programs(2) - 1)
    def _():
        acc = acc_ref[...]
        if bias_ref is not None:
            acc = acc + bias_ref[...].astype(jnp.float32)
        o_ref[...] = acc.astype(o_ref.dtype)


def _tiled_kernel(x_ref, w_ref, o_ref, acc_ref):
    _tiled_body(x_ref, w_ref, o_ref, acc_ref)


def _tiled_bias_kernel(x_ref, w_ref, b_ref, o_ref, acc_ref):
    _tiled_body(x_ref, w_ref, o_ref, acc_ref, bias_ref=b_ref)


# ---------------- Parameter preparation (one-time, outside hot path) ----------------

def prepare_linear_norm_params(weight, bias=None, compute_dtype=None):
    """One-time prep: (out_features, in_features) PyTorch weight -> kernel layout.

    Returns (w_kn, bias2d, out_features):
      w_kn:   (in_features, N_pad) weight in (K, N) layout, N padded to a multiple
              of 128 (lane-dense stores), cast to compute_dtype if given.
      bias2d: (1, N_pad) float32 bias, or None.
    """
    out_features, in_features = weight.shape
    w = weight.astype(compute_dtype) if compute_dtype is not None else weight
    w_kn = w.T  # (K, N)
    n_pad = _round_up(out_features, 128)
    if n_pad != out_features:
        w_kn = jnp.pad(w_kn, ((0, 0), (0, n_pad - out_features)))
    bias2d = None
    if bias is not None:
        b = bias.astype(jnp.float32)
        if n_pad != out_features:
            b = jnp.pad(b, (0, n_pad - out_features))
        bias2d = b.reshape(1, n_pad)
    return w_kn, bias2d, out_features


def init_linear_norm_params(key, in_features, out_features, bias=False):
    """Deterministic xavier_uniform_ init matching nn.init.xavier_uniform_."""
    limit = math.sqrt(6.0 / (in_features + out_features))
    w = jax.random.uniform(
        key, (out_features, in_features), jnp.float32, -limit, limit
    )
    b = jnp.zeros((out_features,), jnp.float32) if bias else None
    return w, b


# ---------------- Forward ----------------

def linear_norm(x, w_kn, bias2d=None, *, out_features=None, compute_dtype=None,
                tm=512, tn=512, tk=1024, force_tiled=False):
    """LinearNorm forward: x @ W^T (+ bias), with W prepared as (K, N_pad).

    x:      (..., in_features)
    w_kn:   (in_features, N_pad) from prepare_linear_norm_params
    bias2d: (1, N_pad) float32, or None
    """
    K, N_pad = w_kn.shape
    if out_features is None:
        out_features = N_pad
    orig_shape = x.shape
    assert orig_shape[-1] == K

    out_dtype = x.dtype
    if compute_dtype is not None and x.dtype != compute_dtype:
        x = x.astype(compute_dtype)
    x2d = x.reshape(-1, K)
    M = x2d.shape[0]

    x_itm = jnp.dtype(x2d.dtype).itemsize
    w_itm = jnp.dtype(w_kn.dtype).itemsize
    o_itm = jnp.dtype(out_dtype).itemsize
    budget = _vmem_budget_bytes()
    w_bytes = K * N_pad * w_itm
    b_bytes = N_pad * 4 if bias2d is not None else 0

    resident = (not force_tiled) and (w_bytes <= int(budget * 0.35))

    if resident:
        # ---- Weight held in VMEM (constant block index => DMA'd once). ----
        fixed = 2 * (w_bytes + b_bytes)                 # conservative: 2 buffers each
        per_row = 2 * (K * x_itm + N_pad * o_itm)       # double-buffered x + out rows
        tm_cap = max(8, ((budget - fixed - (2 << 20)) // per_row) // 8 * 8)
        tm_eff = max(8, min(tm, tm_cap, _round_up(M, 8)))
        # Keep >= 2 parallel blocks for megacore (v7x: 2 TCs) when M is non-trivial.
        if pl.cdiv(M, tm_eff) == 1 and M >= 256:
            tm_eff = max(8, _round_up(pl.cdiv(M, 2), 8))
        grid = (pl.cdiv(M, tm_eff),)

        x_spec = pl.BlockSpec((tm_eff, K), lambda i: (i, 0))
        w_spec = pl.BlockSpec((K, N_pad), lambda i: (0, 0))      # resident weight
        o_spec = pl.BlockSpec((tm_eff, N_pad), lambda i: (i, 0))
        out_shape = jax.ShapeDtypeStruct((M, N_pad), out_dtype)

        vmem_limit = int(min(budget,
                             max(fixed + tm_eff * per_row + (4 << 20), 32 << 20)))
        cost = pl.CostEstimate(
            flops=2 * M * K * N_pad,
            transcendentals=0,
            bytes_accessed=M * K * x_itm + w_bytes + b_bytes + M * N_pad * o_itm,
        )
        cparams = pltpu.CompilerParams(
            dimension_semantics=("parallel",),
            vmem_limit_bytes=vmem_limit,
        )
        if bias2d is None:
            out2d = pl.pallas_call(
                _resident_kernel,
                out_shape=out_shape,
                grid_spec=pltpu.PrefetchScalarGridSpec(
                    num_scalar_prefetch=0, grid=grid,
                    in_specs=[x_spec, w_spec], out_specs=o_spec),
                compiler_params=cparams, cost_estimate=cost,
            )(x2d, w_kn)
        else:
            b_spec = pl.BlockSpec((1, N_pad), lambda i: (0, 0))
            out2d = pl.pallas_call(
                _resident_bias_kernel,
                out_shape=out_shape,
                grid_spec=pltpu.PrefetchScalarGridSpec(
                    num_scalar_prefetch=0, grid=grid,
                    in_specs=[x_spec, w_spec, b_spec], out_specs=o_spec),
                compiler_params=cparams, cost_estimate=cost,
            )(x2d, w_kn, bias2d)
    else:
        # ---- (m, n, k) tiled fallback with f32 accumulator. ----
        tm_eff = max(8, min(tm, _round_up(M, 8)))
        tn_eff = min(_round_up(tn, 128), N_pad)
        tk_eff = min(_round_up(tk, 128), _round_up(K, 128))

        def _need(tm_, tn_, tk_):
            return (2 * (tm_ * tk_ * x_itm + tk_ * tn_ * w_itm
                         + tn_ * 4 + tm_ * tn_ * o_itm)
                    + tm_ * tn_ * 4)

        while _need(tm_eff, tn_eff, tk_eff) > budget and tk_eff > 128:
            tk_eff //= 2
        while _need(tm_eff, tn_eff, tk_eff) > budget and tn_eff > 128:
            tn_eff //= 2
        while _need(tm_eff, tn_eff, tk_eff) > budget and tm_eff > 8:
            tm_eff = max(8, tm_eff // 2)

        # The contraction dim must be a multiple of tk: zero-pad only if needed
        # (garbage OOB reads along K would corrupt the result).
        K_pad = _round_up(K, tk_eff)
        x_p, w_p = x2d, w_kn
        if K_pad != K:
            x_p = jnp.pad(x2d, ((0, 0), (0, K_pad - K)))
            w_p = jnp.pad(w_kn, ((0, K_pad - K), (0, 0)))

        m_blocks = pl.cdiv(M, tm_eff)
        n_blocks = pl.cdiv(N_pad, tn_eff)
        k_blocks = K_pad // tk_eff
        grid = (m_blocks, n_blocks, k_blocks)

        x_spec = pl.BlockSpec((tm_eff, tk_eff), lambda m, n, k: (m, k))
        w_spec = pl.BlockSpec((tk_eff, tn_eff), lambda m, n, k: (k, n))
        o_spec = pl.BlockSpec((tm_eff, tn_eff), lambda m, n, k: (m, n))
        out_shape = jax.ShapeDtypeStruct((M, N_pad), out_dtype)
        scratch = [pltpu.VMEM((tm_eff, tn_eff), jnp.float32)]

        vmem_limit = int(min(budget,
                             max(_need(tm_eff, tn_eff, tk_eff) + (4 << 20),
                                 32 << 20)))
        # Under this tiling x is streamed n_blocks times, the weight m_blocks times.
        cost = pl.CostEstimate(
            flops=2 * M * K_pad * N_pad,
            transcendentals=0,
            bytes_accessed=(n_blocks * M * K_pad * x_itm
                            + m_blocks * K_pad * N_pad * w_itm
                            + M * N_pad * o_itm),
        )
        cparams = pltpu.CompilerParams(
            dimension_semantics=("parallel", "parallel", "arbitrary"),
            vmem_limit_bytes=vmem_limit,
        )
        if bias2d is None:
            out2d = pl.pallas_call(
                _tiled_kernel,
                out_shape=out_shape,
                grid_spec=pltpu.PrefetchScalarGridSpec(
                    num_scalar_prefetch=0, grid=grid,
                    in_specs=[x_spec, w_spec], out_specs=o_spec,
                    scratch_shapes=scratch),
                compiler_params=cparams, cost_estimate=cost,
            )(x_p, w_p)
        else:
            b_spec = pl.BlockSpec((1, tn_eff), lambda m, n, k: (0, n))
            out2d = pl.pallas_call(
                _tiled_bias_kernel,
                out_shape=out_shape,
                grid_spec=pltpu.PrefetchScalarGridSpec(
                    num_scalar_prefetch=0, grid=grid,
                    in_specs=[x_spec, w_spec, b_spec], out_specs=o_spec,
                    scratch_shapes=scratch),
                compiler_params=cparams, cost_estimate=cost,
            )(x_p, w_p, bias2d)

    if N_pad != out_features:
        out2d = out2d[:, :out_features]
    return out2d.reshape(*orig_shape[:-1], out_features)


if __name__ == "__main__":
    key = jax.random.PRNGKey(0)
    k_x, k_w, k_b = jax.random.split(key, 3)

    batch, seq, in_features, out_features = 2, 8, 32, 32
    x = jax.random.normal(k_x, (batch, seq, in_features), jnp.float32)

    # Module default: bias=False.
    weight, bias = init_linear_norm_params(k_w, in_features, out_features, bias=False)
    w_kn, b2d, n_out = prepare_linear_norm_params(weight, bias)   # one-time prep
    out = jax.block_until_ready(linear_norm(x, w_kn, b2d, out_features=n_out))
    ref = jnp.einsum("bsi,oi->bso", x, weight)
    assert out.shape == (batch, seq, out_features)
    assert jnp.allclose(out, ref, atol=1e-5, rtol=1e-5)

    # Bias path.
    bias_b = jax.random.normal(k_b, (out_features,), jnp.float32)
    w_kn_b, b2d_b, n_out_b = prepare_linear_norm_params(weight, bias_b)
    out_b = jax.block_until_ready(linear_norm(x, w_kn_b, b2d_b, out_features=n_out_b))
    ref_b = ref + bias_b
    assert jnp.allclose(out_b, ref_b, atol=1e-5, rtol=1e-5)

    # bf16 compute path (f32 accumulation; looser tolerance vs f32 reference).
    w_kn_bf, b2d_bf, n_out_bf = prepare_linear_norm_params(
        weight, None, compute_dtype=jnp.bfloat16)
    out_bf = jax.block_until_ready(
        linear_norm(x, w_kn_bf, None, out_features=n_out_bf,
                    compute_dtype=jnp.bfloat16))
    assert jnp.allclose(out_bf.astype(jnp.float32), ref, atol=5e-2, rtol=5e-2)

    # (m, n, k) tiled fallback path, exercised explicitly for coverage.
    out_t = jax.block_until_ready(
        linear_norm(x, w_kn, None, out_features=n_out, force_tiled=True))
    assert jnp.allclose(out_t, ref, atol=1e-5, rtol=1e-5)

    print("KERNEL_OK")
</pallas_src>

<mosaic_0001>
module attributes {stable_mosaic.version = 11 : i64} {
  func.func @_resident_kernel(%arg0: i32, %arg1: memref<16x32xf32, #tpu.memory_space<vmem>>, %arg2: memref<32x128xf32, #tpu.memory_space<vmem>>, %arg3: memref<16x128xf32, #tpu.memory_space<vmem>>) attributes {dimension_semantics = [#tpu.dimension_semantics<parallel>], iteration_bounds = array<i64: 1>, scalar_prefetch = 0 : i64, scratch_operands = 0 : i64, tpu.core_type = #tpu.core_type<tc>, window_params = [{transform_indices = @transform_0, window_bounds = array<i64: 16, 32>}, {pipeline_mode = #tpu.pipeline_mode<synchronous>, transform_indices = @transform_1, window_bounds = array<i64: 32, 128>}, {transform_indices = @transform_2, window_bounds = array<i64: 16, 128>}]} {
    %c0 = arith.constant 0 : index
    %c0_0 = arith.constant 0 : index
    %0 = vector.load %arg1[%c0, %c0_0] : memref<16x32xf32, #tpu.memory_space<vmem>>, vector<16x32xf32>
    %c0_1 = arith.constant 0 : index
    %c0_2 = arith.constant 0 : index
    %1 = vector.load %arg2[%c0_1, %c0_2] : memref<32x128xf32, #tpu.memory_space<vmem>>, vector<32x128xf32>
    %cst = arith.constant dense<0.000000e+00> : vector<16x128xf32>
    %2 = tpu.matmul %0, %1, %cst {dimension_numbers = #tpu.dot_dimension_numbers<[1], [0], [0], [1], [0, 0, 1, 1], [], []>} : vector<16x32xf32>, vector<32x128xf32>, vector<16x128xf32> -> vector<16x128xf32>
    %c0_3 = arith.constant 0 : index
    %c0_4 = arith.constant 0 : index
    %3 = vector.load %arg3[%c0_3, %c0_4] : memref<16x128xf32, #tpu.memory_space<vmem>>, vector<16x128xf32>
    tpu.vector_store %arg3[%c0_3, %c0_4], %2 {strides = array<i32>} : memref<16x128xf32, #tpu.memory_space<vmem>>, vector<16x128xf32>,
    return
  }
  func.func @transform_0(%arg0: i32) -> (i32, i32) {
    %c0_i32 = arith.constant 0 : i32
    %c0_i32_0 = arith.constant 0 : i32
    return %arg0, %c0_i32 : i32, i32
  }
  func.func @transform_1(%arg0: i32) -> (i32, i32) {
    %c0_i32 = arith.constant 0 : i32
    %c0_i32_0 = arith.constant 0 : i32
    %c0_i32_1 = arith.constant 0 : i32
    return %c0_i32, %c0_i32_0 : i32, i32
  }
  func.func @transform_2(%arg0: i32) -> (i32, i32) {
    %c0_i32 = arith.constant 0 : i32
    %c0_i32_0 = arith.constant 0 : i32
    return %arg0, %c0_i32 : i32, i32
  }
}

</mosaic_0001>

<bundles_post_ra>
// kernel: tpu_custom_call.1
= control target key start
LH: loop header
LB: loop body
LE: loop exit
PB: predicated region body
PF: predicated region fallthrough
CT: control target
= control target key end

     0   :  { %7 = vsyncpa [#allocation3], 0  ;;  %s278_s0 = inlined_call_operand.hbm [shape: f32[16,32], index: 0, kind: input, shape index: {}]   ;;  %s279_s1 = inlined_call_operand.hbm [shape: f32[32,128], index: 1, kind: input, shape index: {}]   ;;  %s280_s2 = inlined_call_operand.hbm [shape: f32[16,128], index: 2, kind: output, shape index: {}]  }
   0x1   :  { %8 = vsyncpa [#allocation6], 0 }
   0x2   :  { %9 = vsyncpa [#allocation4], 0  ;;  %s238_s9 = smov [#allocation2]  }
   0x3   :  { %s15_s10 = sshll.u32 %s238_s9, 4  ;;  %s16_s10 = int_to_ptr.vmem [resolvable:$true] %s15_s10 }
   0x4   :  { %s180_s11 = scalar_lea.vmem %s16_s10, 256  ;;  %p185_p1 = scmp.lt.s32.totalorder %s16_s10, %s16_s10 }
   0x5   :  { %p181_p0 = scmp.ne.s32.totalorder %s16_s10, %s180_s11  ;;  %p186_p2 = scmp.lt.s32.totalorder %s180_s11, %s180_s11 }
   0x7   :  { %p187_p3 = por %p186_p2, %p185_p1 }
   0x9   :  { %p188_p4 = pnand %p187_p3, %p181_p0 }
   0xb   :  { %191 = shalt.err (!%p188_p4)
}
   0xc   :  { %s239_s12 = smov 128   ;;  %s240_s13 = smov 8  }
   0xd   :  { %21 = dma.hbm_to_vmem [thread:$0]  %s278_s0, 256, %s16_s10, [#allocation3], %s239_s12, %s239_s12, %s240_s13  }
   0xe   :  { %s241_s16 = smov [#allocation5]  }
   0xf   :  { %s27_s17 = sshll.u32 %s241_s16, 4  ;;  %s28_s17 = int_to_ptr.vmem [resolvable:$true] %s27_s17 }
  0x10   :  { %s200_s18 = scalar_lea.vmem %s28_s17, 512  ;;  %p205_p6 = scmp.lt.s32.totalorder %s28_s17, %s28_s17 }
  0x11   :  { %p201_p5 = scmp.ne.s32.totalorder %s28_s17, %s200_s18  ;;  %p206_p7 = scmp.lt.s32.totalorder %s200_s18, %s200_s18 }
  0x13   :  { %p207_p8 = por %p206_p7, %p205_p6 }
  0x15   :  { %p208_p9 = pnand %p207_p8, %p201_p5 }
  0x17   :  { %211 = shalt.err (!%p208_p9)
}
  0x18   :  { %33 = dma.hbm_to_vmem [thread:$0]  %s279_s1, 512, %s28_s17, [#allocation6], %s239_s12, %s239_s12, %s240_s13  }
  0x19   :  { %232 = dma.done.wait [#allocation3], 256  }
  0x1a   :  { %233 = vsyncadd [#allocation3], 4294967040 }
  0x1b   :  { %234 = dma.done.wait [#allocation6], 512  }
  0x1c   :  { %235 = vsyncadd [#allocation6], 4294966784  ;;  %vm46_vm0 = vcmask 261120   ;;  %v45_v0 = vld [vmem:[#allocation5 + $0x18] sm:$0xff]  ;;  %v44_v1 = vld [vmem:[#allocation5 + $0x10] sm:$0xff]  ;;  %s242_s0 = smov [#allocation7]  }
  0x1d   :  { %156 = vmatprep.subr.mxu0 %v45_v0  ;;  %v40_v2 = vld [vmem:[#allocation2] sm:$0xff]  ;;  %v43_v3 = vld [vmem:[#allocation5 + $0x8] sm:$0xff]  ;;  %v42_v4 = vld [vmem:[#allocation5] sm:$0xff]  ;;  %s135_s1 = sshll.u32 %s242_s0, 4  ;;  %s136_s1 = int_to_ptr.vmem [resolvable:$true] %s135_s1 }
  0x1e   :  { %157 = vmatpush3.msra.mxu0 %v45_v0  ;;  %164 = vmatprep.mubr.msk.f32.mxu0 %vm46_vm0, %v40_v2  ;;  %v41_v5 = vld [vmem:[#allocation2 + $0x8] sm:$0xff]  ;;  %s212_s21 = scalar_lea.vmem %s136_s1, 256  ;;  %p217_p11 = scmp.lt.s32.totalorder %s136_s1, %s136_s1 }
  0x1f   :  { %158 = vmatprep.subr.mxu0 %v44_v1  ;;  %p213_p10 = scmp.ne.s32.totalorder %s136_s1, %s212_s21  ;;  %p218_p12 = scmp.lt.s32.totalorder %s212_s21, %s212_s21 }
  0x20   :  { %159 = vmatpush3.msra.mxu0 %v44_v1 }
  0x21   :  { %160 = vmatprep.subr.mxu0 %v43_v3  ;;  %p219_p13 = por %p218_p12, %p217_p11 }
  0x22   :  { %161 = vmatpush3.msra.mxu0 %v43_v3 }
  0x23   :  { %162 = vmatprep.subr.mxu0 %v42_v4  ;;  %p220_p0 = pnand %p219_p13, %p213_p10 }
  0x24   :  { %163 = vmatpush3.msra.mxu0 %v42_v4 }
  0x25   :  { %165 = vmatmul.mubr.msk.f32.vlgmr.msra.gmra.mxu0 %vm46_vm0, %v41_v5 }
  0xe5   :  { %v166_v6 = vpop.f32.mrf.mxu0 }
  0xe6   :  { %129 = vst [vmem:[#allocation7 + $0x8] sm:$0xff] %v166_v6 }
  0xe7   :  { %v119_v7 = vpop.f32.mrf.mxu0 }
  0xe8   :  { %128 = vst [vmem:[#allocation7] sm:$0xff] %v119_v7 }
  0xe9   :  { %223 = shalt.err (!%p220_p0)
}
  0xea   :  { %141 = dma.vmem_to_hbm [thread:$0]  %s136_s1, 256, %s280_s2, [#allocation4], %s239_s12, %s239_s12, %s240_s13  }
  0xeb   :  { %236 = dma.done.wait [#allocation4], 256  }
  0xec   :  { %237 = vsyncadd [#allocation4], 4294967040 }
  0xed   :  { %145 = vsyncpa [#allocation3], 1 }
  0xee   :  { %146 = vsyncpa [#allocation6], 1 }
  0xef   :  { %147 = vsyncpa [#allocation4], 1 }

</bundles_post_ra>
